<compile_context>
chip_gen: v5e
topology: v5e:2x2
jax: 0.10.0
libtpu: 0.0.40
codegen_flags: <defaults>
</compile_context>

<pallas_src>
import functools

import jax
import jax.numpy as jnp
from jax.experimental import pallas as pl
from jax.experimental.pallas import tpu as pltpu


def _focal_loss_kernel(x_ref, t_ref, o_ref, *, gamma: float, n_total: int, tile_n: int):
    # x_ref: (TILE_N, C) logits (any float dtype), t_ref: (TILE_N, 1) int32 targets
    x = x_ref[...].astype(jnp.float32)
    tn, c = x.shape

    # Numerically-stable softmax statistics over the class (lane) axis.
    m = jnp.max(x, axis=-1, keepdims=True)            # (TILE_N, 1)
    shifted = x - m
    z = jnp.sum(jnp.exp(shifted), axis=-1, keepdims=True)  # (TILE_N, 1)
    logz = jnp.log(z)

    # Gather shifted[row, target[row]] via a one-hot mask (exactly one hit per row).
    col_ids = jax.lax.broadcasted_iota(jnp.int32, (tn, c), 1)
    onehot = col_ids == t_ref[...]                    # (TILE_N, C) via (TILE_N,1) bcast
    shifted_t = jnp.sum(jnp.where(onehot, shifted, 0.0), axis=-1, keepdims=True)

    # Per-row focal term: logp_t, p_t, (1-p_t)^gamma * logp_t.
    logp_t = shifted_t - logz                         # (TILE_N, 1)
    p_t = jnp.exp(logp_t)
    one_minus_p = 1.0 - p_t
    if float(gamma).is_integer() and gamma >= 0:
        mod = jnp.ones_like(one_minus_p)
        for _ in range(int(gamma)):                   # gamma=2 -> (1-p)*(1-p), pure VPU
            mod = mod * one_minus_p
    else:
        mod = jnp.power(jnp.maximum(one_minus_p, 0.0), gamma)
    focal_t = mod * logp_t                            # (TILE_N, 1)

    # Mask rows added by padding so they contribute 0 to the global sum.
    row0 = pl.program_id(0) * tile_n
    row_ids = row0 + jax.lax.broadcasted_iota(jnp.int32, (tn, 1), 0)
    o_ref[...] = jnp.where(row_ids < n_total, focal_t, 0.0)


def focal_loss(logits, targets, gamma=2.0):
    """logits: (N, C) float (f32/bf16), targets: (N,) int. Returns scalar f32 loss
    matching FocalLoss(weight=None, gamma, reduction='mean')."""
    # TODO(synk): per-class `weight` and ignore_index nll_loss options not implemented
    # (module defaults weight=None, so mean reduction divides by N).
    n, c = logits.shape

    # Tile the batch dim: ~2 MiB per logits buffer, multiple of 8 sublanes.
    tile_n = max(8, min(1024, ((2 << 20) // max(1, c * 4)) // 8 * 8))
    tile_n = min(tile_n, ((n + 7) // 8) * 8)
    n_pad = ((n + tile_n - 1) // tile_n) * tile_n

    if n_pad != n:
        logits_p = jnp.pad(logits, ((0, n_pad - n), (0, 0)))
        targets_p = jnp.pad(targets.astype(jnp.int32), (0, n_pad - n))
    else:
        logits_p = logits
        targets_p = targets.astype(jnp.int32)
    t2d = targets_p.reshape(n_pad, 1)

    grid = (n_pad // tile_n,)
    out = pl.pallas_call(
        functools.partial(
            _focal_loss_kernel, gamma=float(gamma), n_total=n, tile_n=tile_n
        ),
        out_shape=jax.ShapeDtypeStruct((n_pad, 1), jnp.float32),
        grid_spec=pltpu.PrefetchScalarGridSpec(
            num_scalar_prefetch=0,
            grid=grid,
            in_specs=[
                pl.BlockSpec((tile_n, c), lambda i: (i, 0)),
                pl.BlockSpec((tile_n, 1), lambda i: (i, 0)),
            ],
            out_specs=pl.BlockSpec((tile_n, 1), lambda i: (i, 0)),
        ),
        compiler_params=pltpu.CompilerParams(
            dimension_semantics=("parallel",),
        ),
    )(logits_p, t2d)  # native logits dtype; cast to f32 happens inside the kernel

    # nll_loss(reduction='mean', weight=None): -mean over the N real rows.
    return -jnp.sum(out) / jnp.float32(n)


def _reference_focal_loss(logits, targets, gamma=2.0):
    log_prob = jax.nn.log_softmax(logits.astype(jnp.float32), axis=-1)
    prob = jnp.exp(log_prob)
    focal = (1.0 - prob) ** gamma * log_prob
    picked = jnp.take_along_axis(
        focal, targets[:, None].astype(jnp.int32), axis=-1
    )[:, 0]
    return -jnp.mean(picked)


if __name__ == "__main__":
    key = jax.random.PRNGKey(0)
    k1, k2 = jax.random.split(key)

    N, C = 8, 32  # small demo: batch of 8 samples, 32 classes
    logits = jax.random.normal(k1, (N, C), dtype=jnp.float32)
    targets = jax.random.randint(k2, (N,), 0, C, dtype=jnp.int32)

    loss = focal_loss(logits, targets, gamma=2.0)
    jax.block_until_ready(loss)

    ref = _reference_focal_loss(logits, targets, gamma=2.0)
    assert jnp.allclose(loss, ref, atol=1e-5, rtol=1e-5), (loss, ref)

    print("KERNEL_OK")
</pallas_src>

<mosaic_0001>
module attributes {stable_mosaic.version = 11 : i64} {
  func.func @_focal_loss_kernel(%arg0: i32, %arg1: memref<8x32xf32, #tpu.memory_space<vmem>>, %arg2: memref<8x1xi32, #tpu.memory_space<vmem>>, %arg3: memref<8x1xf32, #tpu.memory_space<vmem>>) attributes {dimension_semantics = [#tpu.dimension_semantics<parallel>], iteration_bounds = array<i64: 1>, scalar_prefetch = 0 : i64, scratch_operands = 0 : i64, tpu.core_type = #tpu.core_type<tc>, window_params = [{transform_indices = @transform_0, window_bounds = array<i64: 8, 32>}, {transform_indices = @transform_1, window_bounds = array<i64: 8, 1>}, {transform_indices = @transform_2, window_bounds = array<i64: 8, 1>}]} {
    %c0 = arith.constant 0 : index
    %c0_0 = arith.constant 0 : index
    %0 = vector.load %arg1[%c0, %c0_0] : memref<8x32xf32, #tpu.memory_space<vmem>>, vector<8x32xf32>
    %cst = arith.constant dense<0xFF800000> : vector<8xf32>
    %1 = vector.multi_reduction <maximumf>, %0, %cst [1] : vector<8x32xf32> to vector<8xf32>
    %2 = vector.shape_cast %1 : vector<8xf32> to vector<8x1xf32>
    %3 = vector.broadcast %2 : vector<8x1xf32> to vector<8x32xf32>
    %4 = arith.subf %0, %3 : vector<8x32xf32>
    %5 = math.exp %4 : vector<8x32xf32>
    %cst_1 = arith.constant dense<0.000000e+00> : vector<8xf32>
    %6 = vector.multi_reduction <add>, %5, %cst_1 [1] : vector<8x32xf32> to vector<8xf32>
    %7 = vector.shape_cast %6 : vector<8xf32> to vector<8x1xf32>
    %8 = math.log %7 : vector<8x1xf32>
    %9 = tpu.iota {dimensions = array<i32: 1>} : vector<8x32xi32>
    %c0_2 = arith.constant 0 : index
    %c0_3 = arith.constant 0 : index
    %10 = vector.load %arg2[%c0_2, %c0_3] : memref<8x1xi32, #tpu.memory_space<vmem>>, vector<8x1xi32>
    %11 = vector.broadcast %10 : vector<8x1xi32> to vector<8x32xi32>
    %12 = arith.cmpi eq, %9, %11 : vector<8x32xi32>
    %cst_4 = arith.constant 0.000000e+00 : f32
    %13 = vector.broadcast %cst_4 : f32 to vector<8x32xf32>
    %14 = arith.select %12, %4, %13 : vector<8x32xi1>, vector<8x32xf32>
    %cst_5 = arith.constant dense<0.000000e+00> : vector<8xf32>
    %15 = vector.multi_reduction <add>, %14, %cst_5 [1] : vector<8x32xf32> to vector<8xf32>
    %16 = vector.shape_cast %15 : vector<8xf32> to vector<8x1xf32>
    %17 = arith.subf %16, %8 : vector<8x1xf32>
    %18 = math.exp %17 : vector<8x1xf32>
    %cst_6 = arith.constant 1.000000e+00 : f32
    %19 = vector.broadcast %cst_6 : f32 to vector<8x1xf32>
    %20 = arith.subf %19, %18 : vector<8x1xf32>
    %cst_7 = arith.constant 1.000000e+00 : f32
    %21 = vector.broadcast %cst_7 : f32 to vector<8x1xf32>
    %22 = arith.mulf %21, %20 : vector<8x1xf32>
    %23 = arith.mulf %22, %20 : vector<8x1xf32>
    %24 = arith.mulf %23, %17 : vector<8x1xf32>
    %c8_i32 = arith.constant 8 : i32
    %25 = arith.muli %arg0, %c8_i32 : i32
    %26 = tpu.iota {dimensions = array<i32: 0>} : vector<8x1xi32>
    %27 = vector.broadcast %25 : i32 to vector<8x1xi32>
    %28 = arith.addi %27, %26 : vector<8x1xi32>
    %c8_i32_8 = arith.constant 8 : i32
    %29 = vector.broadcast %c8_i32_8 : i32 to vector<8x1xi32>
    %30 = arith.cmpi slt, %28, %29 : vector<8x1xi32>
    %cst_9 = arith.constant 0.000000e+00 : f32
    %31 = vector.broadcast %cst_9 : f32 to vector<8x1xf32>
    %32 = arith.select %30, %24, %31 : vector<8x1xi1>, vector<8x1xf32>
    %c0_10 = arith.constant 0 : index
    %c0_11 = arith.constant 0 : index
    %33 = vector.load %arg3[%c0_10, %c0_11] : memref<8x1xf32, #tpu.memory_space<vmem>>, vector<8x1xf32>
    tpu.vector_store %arg3[%c0_10, %c0_11], %32 {strides = array<i32>} : memref<8x1xf32, #tpu.memory_space<vmem>>, vector<8x1xf32>,
    return
  }
  func.func @transform_0(%arg0: i32) -> (i32, i32) {
    %c0_i32 = arith.constant 0 : i32
    %c0_i32_0 = arith.constant 0 : i32
    return %arg0, %c0_i32 : i32, i32
  }
  func.func @transform_1(%arg0: i32) -> (i32, i32) {
    %c0_i32 = arith.constant 0 : i32
    %c0_i32_0 = arith.constant 0 : i32
    return %arg0, %c0_i32 : i32, i32
  }
  func.func @transform_2(%arg0: i32) -> (i32, i32) {
    %c0_i32 = arith.constant 0 : i32
    %c0_i32_0 = arith.constant 0 : i32
    return %arg0, %c0_i32 : i32, i32
  }
}

</mosaic_0001>

<bundles_post_ra>
// kernel: tpu_custom_call.1
= control target key start
LH: loop header
LB: loop body
LE: loop exit
PB: predicated region body
PF: predicated region fallthrough
CT: control target
= control target key end

     0   :  { %vm12_vm0 = vcmask 261120   ;;  %v62_v1 = vmov 0   ;;  %v24_v9 = vlaneseq  ;;  %vm48_vm2 = vcmask 7168   ;;  %s90_s0 = inlined_call_operand.vmem [shape: f32[8,32], index: 0, kind: input, shape index: {}]   ;;  %s91_s1 = inlined_call_operand.vmem [shape: s32[8,1], index: 1, kind: input, shape index: {}]   ;;  %s92_s2 = inlined_call_operand.vmem [shape: f32[8,1], index: 2, kind: output, shape index: {}]  }
   0x1   :  { %v11_v0 = vld [vmem:[%s90_s0] sm:$0xff]  ;;  %55 = vset.pattern.permute.xlu0 %v62_v1 }
   0x2   :  { %v13_v2 = vsel %vm12_vm0, %v11_v0, -inf  ;;  %v26_v3 = vld [vmem:[%s91_s1] sm:$0xff]  ;;  %v25_v10 = vand.u32 127, %v24_v9 }
   0x3   :  { %14 = vmax.xlane.f32.xlu0 %v13_v2 }
  0x17   :  { %28 = vperm.xlu0 %55, %v26_v3  }
  0x76   :  { %v15_v4 = vpop.xlane.xlu0 %14 }
  0x77   :  { %v16_v5 = vsub.f32 %v11_v0, %v15_v4 }
  0x79   :  { %v17_v6 = vmul.f32 1.442695, %v16_v5 }
  0x7b   :  { %56 = vpow2.f32 %v17_v6 }
  0x81   :  { %v57_v7 = vpop.eup %56 }
  0x82   :  { %v19_v8 = vsel %vm12_vm0, %v57_v7, 0.0 }
  0x83   :  { %20 = vadd.xlane.f32.xlu1 %v19_v8 }
  0x89   :  { %v29_v11 = vpop.permute.xlu0 %28 }
  0x8a   :  { %vm30_vm1 = vcmp.eq.s32.totalorder %v25_v10, %v29_v11 }
  0x8b   :  { %v31_v12 = vsel %vm30_vm1, %v16_v5, 0.0 }
  0x8c   :  { %v32_v13 = vsel %vm12_vm0, %v31_v12, 0.0 }
  0x8d   :  { %33 = vadd.xlane.f32.xlu1 %v32_v13 }
  0xf6   :  { %v21_v14 = vpop.xlane.xlu1 %20 }
  0xf7   :  { %58 = vlog2.f32 %v21_v14 }
  0xfd   :  { %v59_v15 = vpop.eup %58 }
  0xfe   :  { %v23_v16 = vmul.f32 0.6931472, %v59_v15 }
 0x100   :  { %v34_v17 = vpop.xlane.xlu1 %33 }
 0x101   :  { %v35_v18 = vsub.f32 %v34_v17, %v23_v16 }
 0x103   :  { %v36_v19 = vmul.f32 1.442695, %v35_v18 }
 0x105   :  { %60 = vpow2.f32 %v36_v19 }
 0x10b   :  { %v61_v20 = vpop.eup %60 }
 0x10c   :  { %v38_v21 = vsub.f32 1.0, %v61_v20 }
 0x10e   :  { %v39_v22 = vmul.f32 %v38_v21, %v38_v21 }
 0x110   :  { %v40_v23 = vmul.f32 %v39_v22, %v35_v18 }
 0x112   :  { %49 = vst.msk [vmem:[%s92_s2] sm:$0xff] %vm48_vm2, %v40_v23 }

</bundles_post_ra>
